<compile_context>
chip_gen: v6e
topology: v6e:2x2x1
jax: 0.10.0
libtpu: 0.0.40
codegen_flags: <defaults>
</compile_context>

<pallas_src>
import functools
import numpy as np
import jax
import jax.numpy as jnp
from jax.experimental import pallas as pl
from jax.experimental.pallas import tpu as pltpu

PAD = 4  # max dilation


def _make_kernel(bt, do_pool, shift):
    def kernel(p_ref, wc_ref, bc_ref, wb_ref, bb_ref, rm_ref, bm_ref, out_ref):
        # p_ref : (bt, 27*C, HW) bf16 im2col patches
        # wc_ref: (18, 27*C) bf16 block-diagonal dilated-conv weights
        # bc_ref: (18, 1) f32 conv bias
        # wb_ref: (19, 18) f32 fused branch1+branch2 1x1 weights; bb_ref (19,1)
        # rm_ref: (HW, R) f32 masked-mean reduce matrix (R = H or W)
        # bm_ref: (R, HW) f32 broadcast-back matrix
        # out_ref: (bt, 37, HW) f32 = cat([b1(18), out1(18), sigmoid(b2)(1)])
        for bi in range(bt):  # static unroll, bt is 1 or 2
            patches = p_ref[bi]                                     # (K, HW)

            # all three dilated 3x3 convs in a single bf16 MXU matmul
            out1 = jnp.dot(wc_ref[...], patches,
                           preferred_element_type=jnp.float32) + bc_ref[...]

            if do_pool:
                # stride-1 max pool: max with the lane-rolled copy (XLU slot,
                # free next to the MXU-bound path).  Wrapped lanes only hit
                # positions (w==W-1 or h==H-1) that the wrapper crops.
                shifted = pltpu.roll(out1, shift, 1)
                pooled = jnp.maximum(out1, shifted)                 # (18, HW)
            else:
                pooled = out1

            # fused branch1/branch2 1x1 convs
            br = jnp.dot(wb_ref[...], pooled,
                         preferred_element_type=jnp.float32) + bb_ref[...]

            # projection pooling = masked row/column mean + broadcast,
            # factorized into two skinny matmuls instead of a (HW,HW) one.
            red = jnp.dot(br, rm_ref[...], preferred_element_type=jnp.float32)
            brp = jnp.dot(red, bm_ref[...], preferred_element_type=jnp.float32)

            # sigmoid on the EUP: exp + approximate reciprocal
            b2_sig = pl.reciprocal(1.0 + jnp.exp(-brp[18:19, :]), approx=True)

            # output = cat([b1 (18), out1 (18), sigmoid(b2) (1)]) -- lane-dense
            out_ref[bi, 0:18, :] = brp[0:18, :]
            out_ref[bi, 18:36, :] = pooled
            out_ref[bi, 36:37, :] = b2_sig

    return kernel


def _num_tensorcores():
    # v7x has 2 TensorCores per chip; v5e/v6e have 1.  Only used to decide the
    # batch tiling (1 mega grid step vs 2 parallel steps).
    try:
        kind = jax.devices()[0].device_kind.lower()
    except Exception:
        return 1
    return 2 if "v7" in kind else 1


@functools.partial(jax.jit, static_argnames=("index", "row_column", "bt"))
def _block_forward_impl(x, params, *, index, row_column, bt):
    B, C, H, W = x.shape
    do_pool = index <= 3
    Ho = H - 1 if (do_pool and row_column == 1) else H
    Wo = W - 1 if (do_pool and row_column == 0) else W
    HW = H * W
    K = 27 * C
    grid_b = -(-B // bt)
    B_pad = grid_b * bt

    # --- im2col: 27 shifted (C, H, W) slabs per batch, flattened to lanes ---
    # TODO(synk): move im2col in-kernel for production resolutions (27x HBM).
    xp = jnp.pad(x, ((0, 0), (0, 0), (PAD, PAD), (PAD, PAD)))
    slabs = []
    for d in (2, 3, 4):
        for ky in range(3):
            for kx in range(3):
                y0 = PAD + (ky - 1) * d
                x0 = PAD + (kx - 1) * d
                slabs.append(xp[:, :, y0:y0 + H, x0:x0 + W])
    patches = jnp.stack(slabs, axis=1).reshape(B, K, HW).astype(jnp.bfloat16)
    if B_pad != B:
        patches = jnp.pad(patches, ((0, B_pad - B), (0, 0), (0, 0)))

    # --- block-diagonal conv weights (18, 27C); row order (d, ky, kx, ic) ---
    wconv = jnp.zeros((18, K), jnp.float32)
    for di, name in enumerate(("conv1", "conv2", "conv3")):
        w = params[name + "_w"].astype(jnp.float32)             # (6, C, 3, 3)
        wt = jnp.transpose(w, (0, 2, 3, 1)).reshape(6, 9 * C)   # (ky, kx, ic)
        wconv = wconv.at[6 * di:6 * (di + 1),
                         9 * C * di:9 * C * (di + 1)].set(wt)
    wconv = wconv.astype(jnp.bfloat16)
    bconv = jnp.concatenate([params["conv1_b"], params["conv2_b"],
                             params["conv3_b"]]).reshape(18, 1).astype(jnp.float32)

    # --- fused 1x1 branch weights (kept f32: tiny matmul, better accuracy) ---
    wbr = jnp.concatenate([params["branch1_w"], params["branch2_w"]],
                          axis=0).astype(jnp.float32)            # (19, 18)
    bbr = jnp.concatenate([params["branch1_b"], params["branch2_b"]]
                          ).reshape(19, 1).astype(jnp.float32)

    # --- factorized projection-mean constants: masked reduce + broadcast ---
    hw = np.arange(HW)
    h_idx, w_idx = hw // W, hw % W
    if row_column == 0:   # mean over valid w within each row h
        R = H
        rmat_np = ((h_idx[:, None] == np.arange(H)[None, :]) &
                   (w_idx[:, None] < Wo)).astype(np.float32) / float(Wo)
        bmat_np = (np.arange(H)[:, None] == h_idx[None, :]).astype(np.float32)
    else:                 # mean over valid h within each column w
        R = W
        rmat_np = ((w_idx[:, None] == np.arange(W)[None, :]) &
                   (h_idx[:, None] < Ho)).astype(np.float32) / float(Ho)
        bmat_np = (np.arange(W)[:, None] == w_idx[None, :]).astype(np.float32)
    rmat = jnp.asarray(rmat_np)
    bmat = jnp.asarray(bmat_np)

    # lane roll that implements the +1 (along W) / +W (along H) shift
    shift = (HW - 1) if row_column == 0 else (HW - W)

    in_specs = [
        pl.BlockSpec((bt, K, HW), lambda g: (g, 0, 0)),
        pl.BlockSpec((18, K), lambda g: (0, 0)),
        pl.BlockSpec((18, 1), lambda g: (0, 0)),
        pl.BlockSpec((19, 18), lambda g: (0, 0)),
        pl.BlockSpec((19, 1), lambda g: (0, 0)),
        pl.BlockSpec((HW, R), lambda g: (0, 0)),
        pl.BlockSpec((R, HW), lambda g: (0, 0)),
    ]
    out_specs = pl.BlockSpec((bt, 37, HW), lambda g: (g, 0, 0))
    out_shape = jax.ShapeDtypeStruct((B_pad, 37, HW), jnp.float32)

    out_flat = pl.pallas_call(
        _make_kernel(bt, do_pool, shift),
        grid=(grid_b,),
        in_specs=in_specs,
        out_specs=out_specs,
        out_shape=out_shape,
        compiler_params=pltpu.CompilerParams(
            dimension_semantics=("parallel",)),
    )(patches, wconv, bconv, wbr, bbr, rmat, bmat)

    # lane-dense slab -> NCHW; crop pooled spatial extent; b2 is row 36
    out = out_flat[:B].reshape(B, 37, H, W)[:, :, :Ho, :Wo]
    b2 = out[:, 36:37]
    return out, b2


def block_forward(x, params, *, index, row_column):
    B = x.shape[0]
    ncores = _num_tensorcores()
    n_steps = min(B, ncores) if ncores > 1 else 1
    bt = -(-B // n_steps)          # batch elements per grid step
    return _block_forward_impl(x, params, index=index, row_column=row_column,
                               bt=bt)


def block_forward_ref(x, params, *, index, row_column):
    """Pure-JAX reference mirroring the PyTorch forward (for verification)."""
    def dconv(x, w, b, d):
        y = jax.lax.conv_general_dilated(
            x, w, window_strides=(1, 1), padding=((d, d), (d, d)),
            rhs_dilation=(d, d), dimension_numbers=("NCHW", "OIHW", "NCHW"))
        return y + b.reshape(1, -1, 1, 1)

    out1 = jnp.concatenate([dconv(x, params["conv1_w"], params["conv1_b"], 2),
                            dconv(x, params["conv2_w"], params["conv2_b"], 3),
                            dconv(x, params["conv3_w"], params["conv3_b"], 4)], axis=1)
    if index <= 3:
        if row_column == 0:
            out1 = jnp.maximum(out1[:, :, :, :-1], out1[:, :, :, 1:])
        else:
            out1 = jnp.maximum(out1[:, :, :-1, :], out1[:, :, 1:, :])

    def c1x1(t, w, b):
        return jnp.einsum("bchw,oc->bohw", t, w) + b.reshape(1, -1, 1, 1)

    b1 = c1x1(out1, params["branch1_w"], params["branch1_b"])
    b2 = c1x1(out1, params["branch2_w"], params["branch2_b"])
    axis = 3 if row_column == 0 else 2
    b1 = jnp.broadcast_to(b1.mean(axis=axis, keepdims=True), b1.shape)
    b2 = jnp.broadcast_to(b2.mean(axis=axis, keepdims=True), b2.shape)
    b2 = jax.nn.sigmoid(b2)
    return jnp.concatenate([b1, out1, b2], axis=1), b2


if __name__ == "__main__":
    key = jax.random.PRNGKey(0)
    ks = jax.random.split(key, 11)
    B, C, H, W = 2, 4, 16, 16
    x = jax.random.normal(ks[0], (B, C, H, W), jnp.float32)

    # Deterministic synthetic parameters (shapes from Block.__init__).
    params = {
        "conv1_w": 0.1 * jax.random.normal(ks[1], (6, C, 3, 3), jnp.float32),
        "conv1_b": 0.1 * jax.random.normal(ks[2], (6,), jnp.float32),
        "conv2_w": 0.1 * jax.random.normal(ks[3], (6, C, 3, 3), jnp.float32),
        "conv2_b": 0.1 * jax.random.normal(ks[4], (6,), jnp.float32),
        "conv3_w": 0.1 * jax.random.normal(ks[5], (6, C, 3, 3), jnp.float32),
        "conv3_b": 0.1 * jax.random.normal(ks[6], (6,), jnp.float32),
        "branch1_w": 0.1 * jax.random.normal(ks[7], (18, 18), jnp.float32),  # 1x1 conv, kh=kw=1 squeezed
        "branch1_b": 0.1 * jax.random.normal(ks[8], (18,), jnp.float32),
        "branch2_w": 0.1 * jax.random.normal(ks[9], (1, 18), jnp.float32),
        "branch2_b": 0.1 * jax.random.normal(ks[10], (1,), jnp.float32),
    }

    configs = [
        (1, 0),   # pooled along W (Block(in_channels=4, i=1, row_column=0))
        (1, 1),   # pooled along H
        (4, 0),   # no pooling (pool-free specialized kernel)
    ]
    for index, row_column in configs:
        out, b2 = block_forward(x, params, index=index, row_column=row_column)
        jax.block_until_ready((out, b2))

        Ho = H - 1 if (index <= 3 and row_column == 1) else H
        Wo = W - 1 if (index <= 3 and row_column == 0) else W
        assert out.shape == (B, 37, Ho, Wo) and b2.shape == (B, 1, Ho, Wo)

        out_r, b2_r = block_forward_ref(x, params, index=index, row_column=row_column)
        # Tolerance covers bf16 conv-matmul operands (f32 accumulation) and the
        # approx reciprocal in the sigmoid; real bugs would be O(0.1-1) off.
        np.testing.assert_allclose(np.asarray(out), np.asarray(out_r),
                                   rtol=2e-2, atol=2e-2)
        np.testing.assert_allclose(np.asarray(b2), np.asarray(b2_r),
                                   rtol=2e-2, atol=2e-2)

    print("KERNEL_OK")
</pallas_src>

<mosaic_0001>
module attributes {stable_mosaic.version = 11 : i64} {
  func.func @kernel(%arg0: i32, %arg1: memref<2x108x256xbf16, #tpu.memory_space<vmem>>, %arg2: memref<18x108xbf16, #tpu.memory_space<vmem>>, %arg3: memref<18x1xf32, #tpu.memory_space<vmem>>, %arg4: memref<19x18xf32, #tpu.memory_space<vmem>>, %arg5: memref<19x1xf32, #tpu.memory_space<vmem>>, %arg6: memref<256x16xf32, #tpu.memory_space<vmem>>, %arg7: memref<16x256xf32, #tpu.memory_space<vmem>>, %arg8: memref<2x37x256xf32, #tpu.memory_space<vmem>>) attributes {dimension_semantics = [#tpu.dimension_semantics<parallel>], iteration_bounds = array<i64: 1>, scalar_prefetch = 0 : i64, scratch_operands = 0 : i64, tpu.core_type = #tpu.core_type<tc>, window_params = [{transform_indices = @transform_0, window_bounds = array<i64: 2, 108, 256>}, {pipeline_mode = #tpu.pipeline_mode<synchronous>, transform_indices = @transform_1, window_bounds = array<i64: 18, 108>}, {pipeline_mode = #tpu.pipeline_mode<synchronous>, transform_indices = @transform_2, window_bounds = array<i64: 18, 1>}, {pipeline_mode = #tpu.pipeline_mode<synchronous>, transform_indices = @transform_3, window_bounds = array<i64: 19, 18>}, {pipeline_mode = #tpu.pipeline_mode<synchronous>, transform_indices = @transform_4, window_bounds = array<i64: 19, 1>}, {pipeline_mode = #tpu.pipeline_mode<synchronous>, transform_indices = @transform_5, window_bounds = array<i64: 256, 16>}, {pipeline_mode = #tpu.pipeline_mode<synchronous>, transform_indices = @transform_6, window_bounds = array<i64: 16, 256>}, {transform_indices = @transform_7, window_bounds = array<i64: 2, 37, 256>}]} {
    %c0 = arith.constant 0 : index
    %c0_0 = arith.constant 0 : index
    %c0_1 = arith.constant 0 : index
    %0 = vector.load %arg1[%c0, %c0_0, %c0_1] : memref<2x108x256xbf16, #tpu.memory_space<vmem>>, vector<1x108x256xbf16>
    %1 = vector.shape_cast %0 : vector<1x108x256xbf16> to vector<108x256xbf16>
    %c0_2 = arith.constant 0 : index
    %c0_3 = arith.constant 0 : index
    %2 = vector.load %arg2[%c0_2, %c0_3] : memref<18x108xbf16, #tpu.memory_space<vmem>>, vector<18x108xbf16>
    %cst = arith.constant dense<0.000000e+00> : vector<18x256xf32>
    %3 = tpu.matmul %2, %1, %cst {dimension_numbers = #tpu.dot_dimension_numbers<[1], [0], [0], [1], [0, 0, 1, 1], [], []>} : vector<18x108xbf16>, vector<108x256xbf16>, vector<18x256xf32> -> vector<18x256xf32>
    %c0_4 = arith.constant 0 : index
    %c0_5 = arith.constant 0 : index
    %4 = vector.load %arg3[%c0_4, %c0_5] : memref<18x1xf32, #tpu.memory_space<vmem>>, vector<18x1xf32>
    %5 = vector.broadcast %4 : vector<18x1xf32> to vector<18x256xf32>
    %6 = arith.addf %3, %5 : vector<18x256xf32>
    %c255_i32 = arith.constant 255 : i32
    %7 = tpu.dynamic_rotate %6 by %c255_i32 dim 1 : vector<18x256xf32>, i32 -> vector<18x256xf32>
    %8 = arith.maximumf %6, %7 : vector<18x256xf32>
    %c0_6 = arith.constant 0 : index
    %c0_7 = arith.constant 0 : index
    %9 = vector.load %arg4[%c0_6, %c0_7] : memref<19x18xf32, #tpu.memory_space<vmem>>, vector<19x18xf32>
    %cst_8 = arith.constant dense<0.000000e+00> : vector<19x256xf32>
    %10 = tpu.matmul %9, %8, %cst_8 {dimension_numbers = #tpu.dot_dimension_numbers<[1], [0], [0], [1], [0, 0, 1, 1], [], []>} : vector<19x18xf32>, vector<18x256xf32>, vector<19x256xf32> -> vector<19x256xf32>
    %c0_9 = arith.constant 0 : index
    %c0_10 = arith.constant 0 : index
    %11 = vector.load %arg5[%c0_9, %c0_10] : memref<19x1xf32, #tpu.memory_space<vmem>>, vector<19x1xf32>
    %12 = vector.broadcast %11 : vector<19x1xf32> to vector<19x256xf32>
    %13 = arith.addf %10, %12 : vector<19x256xf32>
    %c0_11 = arith.constant 0 : index
    %c0_12 = arith.constant 0 : index
    %14 = vector.load %arg6[%c0_11, %c0_12] : memref<256x16xf32, #tpu.memory_space<vmem>>, vector<256x16xf32>
    %cst_13 = arith.constant dense<0.000000e+00> : vector<19x16xf32>
    %15 = tpu.matmul %13, %14, %cst_13 {dimension_numbers = #tpu.dot_dimension_numbers<[1], [0], [0], [1], [0, 0, 1, 1], [], []>} : vector<19x256xf32>, vector<256x16xf32>, vector<19x16xf32> -> vector<19x16xf32>
    %c0_14 = arith.constant 0 : index
    %c0_15 = arith.constant 0 : index
    %16 = vector.load %arg7[%c0_14, %c0_15] : memref<16x256xf32, #tpu.memory_space<vmem>>, vector<16x256xf32>
    %cst_16 = arith.constant dense<0.000000e+00> : vector<19x256xf32>
    %17 = tpu.matmul %15, %16, %cst_16 {dimension_numbers = #tpu.dot_dimension_numbers<[1], [0], [0], [1], [0, 0, 1, 1], [], []>} : vector<19x16xf32>, vector<16x256xf32>, vector<19x256xf32> -> vector<19x256xf32>
    %18 = vector.extract_strided_slice %17 {offsets = [18, 0], sizes = [1, 256], strides = [1, 1]} : vector<19x256xf32> to vector<1x256xf32>
    %cst_17 = arith.constant 0.000000e+00 : f32
    %19 = vector.broadcast %cst_17 : f32 to vector<1x256xf32>
    %20 = arith.subf %19, %18 : vector<1x256xf32>
    %21 = math.exp %20 : vector<1x256xf32>
    %cst_18 = arith.constant 1.000000e+00 : f32
    %22 = vector.broadcast %cst_18 : f32 to vector<1x256xf32>
    %23 = arith.addf %22, %21 : vector<1x256xf32>
    %24 = tpu.reciprocal %23 {approx = true} : vector<1x256xf32> -> vector<1x256xf32>
    %25 = vector.extract_strided_slice %17 {offsets = [0, 0], sizes = [18, 256], strides = [1, 1]} : vector<19x256xf32> to vector<18x256xf32>
    %c0_19 = arith.constant 0 : index
    %c0_20 = arith.constant 0 : index
    %c0_21 = arith.constant 0 : index
    %26 = vector.load %arg8[%c0_19, %c0_20, %c0_21] : memref<2x37x256xf32, #tpu.memory_space<vmem>>, vector<1x18x256xf32>
    %27 = vector.shape_cast %26 : vector<1x18x256xf32> to vector<18x256xf32>
    %28 = vector.shape_cast %25 : vector<18x256xf32> to vector<1x18x256xf32>
    tpu.vector_store %arg8[%c0_19, %c0_20, %c0_21], %28 {strides = array<i32>} : memref<2x37x256xf32, #tpu.memory_space<vmem>>, vector<1x18x256xf32>,
    %c0_22 = arith.constant 0 : index
    %c18 = arith.constant 18 : index
    %c0_23 = arith.constant 0 : index
    %29 = vector.load %arg8[%c0_22, %c18, %c0_23] : memref<2x37x256xf32, #tpu.memory_space<vmem>>, vector<1x18x256xf32>
    %30 = vector.shape_cast %29 : vector<1x18x256xf32> to vector<18x256xf32>
    %31 = vector.shape_cast %8 : vector<18x256xf32> to vector<1x18x256xf32>
    tpu.vector_store %arg8[%c0_22, %c18, %c0_23], %31 {strides = array<i32>} : memref<2x37x256xf32, #tpu.memory_space<vmem>>, vector<1x18x256xf32>,
    %c0_24 = arith.constant 0 : index
    %c36 = arith.constant 36 : index
    %c0_25 = arith.constant 0 : index
    %32 = vector.load %arg8[%c0_24, %c36, %c0_25] : memref<2x37x256xf32, #tpu.memory_space<vmem>>, vector<1x1x256xf32>
    %33 = vector.shape_cast %32 : vector<1x1x256xf32> to vector<1x256xf32>
    %34 = vector.shape_cast %24 : vector<1x256xf32> to vector<1x1x256xf32>
    tpu.vector_store %arg8[%c0_24, %c36, %c0_25], %34 {strides = array<i32>} : memref<2x37x256xf32, #tpu.memory_space<vmem>>, vector<1x1x256xf32>,
    %c1 = arith.constant 1 : index
    %c0_26 = arith.constant 0 : index
    %c0_27 = arith.constant 0 : index
    %35 = vector.load %arg1[%c1, %c0_26, %c0_27] : memref<2x108x256xbf16, #tpu.memory_space<vmem>>, vector<1x108x256xbf16>
    %36 = vector.shape_cast %35 : vector<1x108x256xbf16> to vector<108x256xbf16>
    %c0_28 = arith.constant 0 : index
    %c0_29 = arith.constant 0 : index
    %37 = vector.load %arg2[%c0_28, %c0_29] : memref<18x108xbf16, #tpu.memory_space<vmem>>, vector<18x108xbf16>
    %cst_30 = arith.constant dense<0.000000e+00> : vector<18x256xf32>
    %38 = tpu.matmul %37, %36, %cst_30 {dimension_numbers = #tpu.dot_dimension_numbers<[1], [0], [0], [1], [0, 0, 1, 1], [], []>} : vector<18x108xbf16>, vector<108x256xbf16>, vector<18x256xf32> -> vector<18x256xf32>
    %c0_31 = arith.constant 0 : index
    %c0_32 = arith.constant 0 : index
    %39 = vector.load %arg3[%c0_31, %c0_32] : memref<18x1xf32, #tpu.memory_space<vmem>>, vector<18x1xf32>
    %40 = vector.broadcast %39 : vector<18x1xf32> to vector<18x256xf32>
    %41 = arith.addf %38, %40 : vector<18x256xf32>
    %c255_i32_33 = arith.constant 255 : i32
    %42 = tpu.dynamic_rotate %41 by %c255_i32_33 dim 1 : vector<18x256xf32>, i32 -> vector<18x256xf32>
    %43 = arith.maximumf %41, %42 : vector<18x256xf32>
    %c0_34 = arith.constant 0 : index
    %c0_35 = arith.constant 0 : index
    %44 = vector.load %arg4[%c0_34, %c0_35] : memref<19x18xf32, #tpu.memory_space<vmem>>, vector<19x18xf32>
    %cst_36 = arith.constant dense<0.000000e+00> : vector<19x256xf32>
    %45 = tpu.matmul %44, %43, %cst_36 {dimension_numbers = #tpu.dot_dimension_numbers<[1], [0], [0], [1], [0, 0, 1, 1], [], []>} : vector<19x18xf32>, vector<18x256xf32>, vector<19x256xf32> -> vector<19x256xf32>
    %c0_37 = arith.constant 0 : index
    %c0_38 = arith.constant 0 : index
    %46 = vector.load %arg5[%c0_37, %c0_38] : memref<19x1xf32, #tpu.memory_space<vmem>>, vector<19x1xf32>
    %47 = vector.broadcast %46 : vector<19x1xf32> to vector<19x256xf32>
    %48 = arith.addf %45, %47 : vector<19x256xf32>
    %c0_39 = arith.constant 0 : index
    %c0_40 = arith.constant 0 : index
    %49 = vector.load %arg6[%c0_39, %c0_40] : memref<256x16xf32, #tpu.memory_space<vmem>>, vector<256x16xf32>
    %cst_41 = arith.constant dense<0.000000e+00> : vector<19x16xf32>
    %50 = tpu.matmul %48, %49, %cst_41 {dimension_numbers = #tpu.dot_dimension_numbers<[1], [0], [0], [1], [0, 0, 1, 1], [], []>} : vector<19x256xf32>, vector<256x16xf32>, vector<19x16xf32> -> vector<19x16xf32>
    %c0_42 = arith.constant 0 : index
    %c0_43 = arith.constant 0 : index
    %51 = vector.load %arg7[%c0_42, %c0_43] : memref<16x256xf32, #tpu.memory_space<vmem>>, vector<16x256xf32>
    %cst_44 = arith.constant dense<0.000000e+00> : vector<19x256xf32>
    %52 = tpu.matmul %50, %51, %cst_44 {dimension_numbers = #tpu.dot_dimension_numbers<[1], [0], [0], [1], [0, 0, 1, 1], [], []>} : vector<19x16xf32>, vector<16x256xf32>, vector<19x256xf32> -> vector<19x256xf32>
    %53 = vector.extract_strided_slice %52 {offsets = [18, 0], sizes = [1, 256], strides = [1, 1]} : vector<19x256xf32> to vector<1x256xf32>
    %cst_45 = arith.constant 0.000000e+00 : f32
    %54 = vector.broadcast %cst_45 : f32 to vector<1x256xf32>
    %55 = arith.subf %54, %53 : vector<1x256xf32>
    %56 = math.exp %55 : vector<1x256xf32>
    %cst_46 = arith.constant 1.000000e+00 : f32
    %57 = vector.broadcast %cst_46 : f32 to vector<1x256xf32>
    %58 = arith.addf %57, %56 : vector<1x256xf32>
    %59 = tpu.reciprocal %58 {approx = true} : vector<1x256xf32> -> vector<1x256xf32>
    %60 = vector.extract_strided_slice %52 {offsets = [0, 0], sizes = [18, 256], strides = [1, 1]} : vector<19x256xf32> to vector<18x256xf32>
    %c1_47 = arith.constant 1 : index
    %c0_48 = arith.constant 0 : index
    %c0_49 = arith.constant 0 : index
    %61 = vector.load %arg8[%c1_47, %c0_48, %c0_49] : memref<2x37x256xf32, #tpu.memory_space<vmem>>, vector<1x18x256xf32>
    %62 = vector.shape_cast %61 : vector<1x18x256xf32> to vector<18x256xf32>
    %63 = vector.shape_cast %60 : vector<18x256xf32> to vector<1x18x256xf32>
    tpu.vector_store %arg8[%c1_47, %c0_48, %c0_49], %63 {strides = array<i32>} : memref<2x37x256xf32, #tpu.memory_space<vmem>>, vector<1x18x256xf32>,
    %c1_50 = arith.constant 1 : index
    %c18_51 = arith.constant 18 : index
    %c0_52 = arith.constant 0 : index
    %64 = vector.load %arg8[%c1_50, %c18_51, %c0_52] : memref<2x37x256xf32, #tpu.memory_space<vmem>>, vector<1x18x256xf32>
    %65 = vector.shape_cast %64 : vector<1x18x256xf32> to vector<18x256xf32>
    %66 = vector.shape_cast %43 : vector<18x256xf32> to vector<1x18x256xf32>
    tpu.vector_store %arg8[%c1_50, %c18_51, %c0_52], %66 {strides = array<i32>} : memref<2x37x256xf32, #tpu.memory_space<vmem>>, vector<1x18x256xf32>,
    %c1_53 = arith.constant 1 : index
    %c36_54 = arith.constant 36 : index
    %c0_55 = arith.constant 0 : index
    %67 = vector.load %arg8[%c1_53, %c36_54, %c0_55] : memref<2x37x256xf32, #tpu.memory_space<vmem>>, vector<1x1x256xf32>
    %68 = vector.shape_cast %67 : vector<1x1x256xf32> to vector<1x256xf32>
    %69 = vector.shape_cast %59 : vector<1x256xf32> to vector<1x1x256xf32>
    tpu.vector_store %arg8[%c1_53, %c36_54, %c0_55], %69 {strides = array<i32>} : memref<2x37x256xf32, #tpu.memory_space<vmem>>, vector<1x1x256xf32>,
    return
  }
  func.func @transform_0(%arg0: i32) -> (i32, i32, i32) {
    %c0_i32 = arith.constant 0 : i32
    %c0_i32_0 = arith.constant 0 : i32
    %c0_i32_1 = arith.constant 0 : i32
    return %arg0, %c0_i32, %c0_i32_0 : i32, i32, i32
  }
  func.func @transform_1(%arg0: i32) -> (i32, i32) {
    %c0_i32 = arith.constant 0 : i32
    %c0_i32_0 = arith.constant 0 : i32
    %c0_i32_1 = arith.constant 0 : i32
    return %c0_i32, %c0_i32_0 : i32, i32
  }
  func.func @transform_2(%arg0: i32) -> (i32, i32) {
    %c0_i32 = arith.constant 0 : i32
    %c0_i32_0 = arith.constant 0 : i32
    %c0_i32_1 = arith.constant 0 : i32
    return %c0_i32, %c0_i32_0 : i32, i32
  }
  func.func @transform_3(%arg0: i32) -> (i32, i32) {
    %c0_i32 = arith.constant 0 : i32
    %c0_i32_0 = arith.constant 0 : i32
    %c0_i32_1 = arith.constant 0 : i32
    return %c0_i32, %c0_i32_0 : i32, i32
  }
  func.func @transform_4(%arg0: i32) -> (i32, i32) {
    %c0_i32 = arith.constant 0 : i32
    %c0_i32_0 = arith.constant 0 : i32
    %c0_i32_1 = arith.constant 0 : i32
    return %c0_i32, %c0_i32_0 : i32, i32
  }
  func.func @transform_5(%arg0: i32) -> (i32, i32) {
    %c0_i32 = arith.constant 0 : i32
    %c0_i32_0 = arith.constant 0 : i32
    %c0_i32_1 = arith.constant 0 : i32
    return %c0_i32, %c0_i32_0 : i32, i32
  }
  func.func @transform_6(%arg0: i32) -> (i32, i32) {
    %c0_i32 = arith.constant 0 : i32
    %c0_i32_0 = arith.constant 0 : i32
    %c0_i32_1 = arith.constant 0 : i32
    return %c0_i32, %c0_i32_0 : i32, i32
  }
  func.func @transform_7(%arg0: i32) -> (i32, i32, i32) {
    %c0_i32 = arith.constant 0 : i32
    %c0_i32_0 = arith.constant 0 : i32
    %c0_i32_1 = arith.constant 0 : i32
    return %arg0, %c0_i32, %c0_i32_0 : i32, i32, i32
  }
}

</mosaic_0001>

<bundles_post_ra>
// kernel: _block_forward_impl.1
= control target key start
LH: loop header
LB: loop body
LE: loop exit
PB: predicated region body
PF: predicated region fallthrough
CT: control target
= control target key end

     0   :  { %vm145_vm0 = vcmask 1045504   ;;  %v1456_v1 = vmov 0   ;;  %vm138_vm1 = vcmask 883712   ;;  %s1457_s16 = smov 127   ;;  %v1458_v30 = vmov 0.0   ;;  %s2068_s0 = inlined_call_operand.vmem [shape: bf16[2,108,256], index: 0, kind: input, shape index: {}]   ;;  %s2069_s1 = inlined_call_operand.vmem [shape: bf16[18,108], index: 1, kind: input, shape index: {}]   ;;  %s2070_s2 = inlined_call_operand.vmem [shape: f32[18,1], index: 2, kind: input, shape index: {}]   ;;  %s2071_s4 = inlined_call_operand.vmem [shape: f32[19,1], index: 4, kind: input, shape index: {}]   ;;  %s2072_s7 = inlined_call_operand.vmem [shape: f32[2,37,256], index: 7, kind: output, shape index: {}]   ;;  %s2073_s3 = inlined_call_operand.vmem [shape: f32[19,18], index: 3, kind: input, shape index: {}]   ;;  %s2074_s5 = inlined_call_operand.vmem [shape: f32[256,16], index: 5, kind: input, shape index: {}]   ;;  %s2075_s6 = inlined_call_operand.vmem [shape: f32[16,256], index: 6, kind: input, shape index: {}]  }
   0x1   :  { %v1394_v0 = vld [vmem:[%s2068_s0 + $0x64] ss:$8 sps:$4 sm:$0x3f]   ;;  %184 = vmatprep.mubr.bf16.mxu0 %v1456_v1  ;;  %1392 = vset.pattern.permute.xlu0 %v1456_v1  ;;  %v1396_v2 = vld [vmem:[%s2068_s0 + $0x60] ss:$8 sps:$4 sm:$0x3f]   ;;  %v215_v43 = vlaneseq }
   0x2   :  { %1393 = vset.pattern.permute.xlu1 %v1456_v1  ;;  %1240 = vmatprep.subr.msk.bf16.mxu0 %vm145_vm0, %v1394_v0  ;;  %v1397_v3 = vld [vmem:[%s2068_s0 + $0x54] ss:$8 sps:$4 sm:$0xff]   ;;  %v147_v4 = vsel %vm145_vm0, %v1396_v2, 0  ;;  %v1399_v5 = vld [vmem:[%s2068_s0 + $0x50] ss:$8 sps:$4 sm:$0xff]   ;;  %v44_v12 = vld [vmem:[%s2070_s2] sm:$0xff] }
   0x3   :  { %155 = vmatpush1.bf16.msra.mxu0 %v147_v4  ;;  %v1400_v6 = vld [vmem:[%s2068_s0 + $0x44] ss:$8 sps:$4 sm:$0xff]   ;;  %v1402_v7 = vld [vmem:[%s2068_s0 + $0x40] ss:$8 sps:$4 sm:$0xff]   ;;  %v1403_v8 = vld [vmem:[%s2068_s0 + $0x34] ss:$8 sps:$4 sm:$0xff]   ;;  %49 = vperm.xlu1 %1393, %v44_v12  }
   0x4   :  { %156 = vmatprep.subr.bf16.mxu0 %v1397_v3  ;;  %v1405_v9 = vld [vmem:[%s2068_s0 + $0x30] ss:$8 sps:$4 sm:$0xff]   ;;  %v1406_v10 = vld [vmem:[%s2068_s0 + $0x24] ss:$8 sps:$4 sm:$0xff]   ;;  %v1408_v14 = vld [vmem:[%s2068_s0 + $0x20] ss:$8 sps:$4 sm:$0xff]   ;;  %332 = vmatprep.mubr.f32.mxu1 %v1458_v30 }
   0x5   :  { %v46_v11 = vld [vmem:[%s2070_s2 + $0x10] sm:$0x3]  ;;  %v45_v13 = vld [vmem:[%s2070_s2 + $0x8] sm:$0xff]  ;;  %v1409_v15 = vld [vmem:[%s2068_s0 + $0x14] ss:$8 sps:$4 sm:$0xff]   ;;  %v1592_v44 = vand.u32 127, %v215_v43 }
   0x6   :  { %59 = vperm.xlu0 %1392, %v46_v11   ;;  %v1411_v16 = vld [vmem:[%s2068_s0 + $0x10] ss:$8 sps:$4 sm:$0xff]   ;;  %v1412_v17 = vld [vmem:[%s2068_s0 + $0x4] ss:$8 sps:$4 sm:$0xff]   ;;  %v1414_v18 = vld [vmem:[%s2068_s0] ss:$8 sps:$4 sm:$0xff]  }
   0x7   :  { %157 = vmatpush1.bf16.msra.mxu0 %v1399_v5  ;;  %v1415_v19 = vld [vmem:[%s2069_s1] sm:$0xff]   ;;  %v1416_v20 = vld [vmem:[%s2069_s1 + $0x8] ss:$0 sps:$4 sm:$0x11]   ;;  %v235_v41 = vld [vmem:[%s2071_s4 + $0x10] sm:$0x7] }
   0x8   :  { %158 = vmatprep.subr.bf16.mxu0 %v1400_v6  ;;  %v1575_v39 = vld [vmem:[%s2071_s4] sm:$0xff]  ;;  %v1581_v40 = vld [vmem:[%s2071_s4 + $0x8] sm:$0xff]  ;;  %v648_v42 = vld [vmem:[%s2070_s2 + $0x10] sm:$0x3]  ;;  %vm217_vm2 = vcmp.lt.s32.totalorder %v1592_v44, 127  ;;  %vm261_vm3 = vcmask 1041408  }
   0x9   :  { %v1620_v6 = vld [vmem:[%s2073_s3] sm:$0xff]  ;;  %vm251_vm4 = vcmask 146432   ;;  %v1635_v11 = vld [vmem:[%s2074_s5 + $0xf0] sm:$0xff]  ;;  %vm467_vm5 = vcmask 130048   ;;  %vm2029_vm6 = vcmp.lt.s32.totalorder %v215_v43, 256 }
   0xa   :  { %54 = vperm.xlu0 %1392, %v45_v13  }
   0xb   :  { %159 = vmatpush1.bf16.msra.mxu0 %v1402_v7  ;;  %v1625_v7 = vld [vmem:[%s2074_s5 + $0xf8] sm:$0xff] }
   0xc   :  { %160 = vmatprep.subr.bf16.mxu0 %v1403_v8 }
   0xf   :  { %161 = vmatpush1.bf16.msra.mxu0 %v1405_v9 }
  0x10   :  { %162 = vmatprep.subr.bf16.mxu0 %v1406_v10  ;;  %v1630_v10 = vld [vmem:[%s2074_s5 + $0x78] sm:$0xff] }
  0x13   :  { %163 = vmatpush1.bf16.msra.mxu0 %v1408_v14  ;;  %v1651_v14 = vld [vmem:[%s2074_s5 + $0x70] sm:$0xff] }
  0x14   :  { %164 = vmatprep.subr.bf16.mxu0 %v1409_v15  ;;  %v1663_v15 = vld [vmem:[%s2073_s3 + $0x8] sm:$0xff] }
  0x17   :  { %165 = vmatpush1.bf16.msra.mxu0 %v1411_v16  ;;  %v1669_v16 = vld [vmem:[%s2074_s5 + $0xe8] sm:$0xff] }
  0x18   :  { %166 = vmatprep.subr.bf16.mxu0 %v1412_v17  ;;  %v1675_v17 = vld [vmem:[%s2074_s5 + $0x68] sm:$0xff] }
  0x1b   :  { %167 = vmatpush1.bf16.msra.mxu0 %v1414_v18  ;;  %v1681_v18 = vld [vmem:[%s2074_s5 + $0xe0] sm:$0xff] }
  0x1e   :  { %1241 = vmatmul.mubr.msk.bf16.vlgmr.msra.gmra.mxu0 %vm138_vm1, %v1415_v19  ;;  %v1689_v19 = vld [vmem:[%s2074_s5 + $0x60] sm:$0xff] }
  0x1f   :  { %194 = vmatprep.mubr.bf16.mxu0 %v1456_v1 }
  0x26   :  { %1242 = vmatmul.mubr.msk.bf16.gmra.mxu0 %vm138_vm1, %v1416_v20  ;;  %v232_v20 = vld [vmem:[%s2073_s3 + $0x10] sm:$0x7] }
  0x27   :  { %541 = vmatprep.mubr.f32.mxu0 %v1458_v30 }
  0x7e   :  { %v50_v32 = vpop.permute.xlu1 %49 }
  0x81   :  { %v60_v21 = vpop.permute.xlu0 %59 }
  0x85   :  { %v55_v24 = vpop.permute.xlu0 %54 }
  0xde   :  { %v186_v22 = vpop.f32.mrf.mxu0 }
  0xdf   :  { %v187_v36 = vadd.f32 %v186_v22, %v50_v32  ;;  %v1705_v22 = vld [vmem:[%s2074_s5 + $0x58] sm:$0xff] }
  0xe0   :  { %v188_v23 = vpop.f32.mrf.mxu0 }
  0xe1   :  { %v189_v38 = vadd.f32 %v188_v23, %v50_v32  ;;  %v1711_v23 = vld [vmem:[%s2074_s5 + $0xd0] sm:$0xff] }
  0xe2   :  { %v190_v25 = vpop.f32.mrf.mxu0  ;;  %v1760_v32 = vld [vmem:[%s2074_s5 + $0xb0] sm:$0xff] }
  0xe3   :  { %v191_v26 = vadd.f32 %v190_v25, %v55_v24  ;;  %v1724_v25 = vld [vmem:[%s2074_s5 + $0xc8] sm:$0xff] }
  0xe4   :  { %v192_v27 = vpop.f32.mrf.mxu0 }
  0xe5   :  { %v193_v28 = vadd.f32 %v192_v27, %v55_v24  ;;  %205 = vrot.lane.b32.xlu1 %v191_v26, %s1457_s16  ;;  %v1718_v24 = vld [vmem:[%s2074_s5 + $0x50] sm:$0xff]  ;;  %v1736_v27 = vld [vmem:[%s2074_s5 + $0xc0] sm:$0xff] }
  0xe6   :  { %v196_v29 = vpop.f32.mrf.mxu0 }
  0xe7   :  { %v197_v31 = vadd.f32 %v196_v29, %v60_v21  ;;  %211 = vrot.lane.b32.xlu0 %v193_v28, %s1457_s16  ;;  %v1748_v29 = vld [vmem:[%s2074_s5 + $0xb8] sm:$0xff] }
  0xe8   :  { %v198_v33 = vpop.f32.mrf.mxu0 }
  0xe9   :  { %v199_v34 = vadd.f32 %v198_v33, %v60_v21  ;;  %207 = vrot.lane.b32.xlu1 %v197_v31, %s1457_s16  ;;  %v1699_v21 = vld [vmem:[%s2074_s5 + $0xd8] sm:$0xff]  ;;  %v1766_v33 = vld [vmem:[%s2074_s5 + $0x30] sm:$0xff] }
  0xea   :  { %v200_v35 = vpop.f32.mrf.mxu0 }
  0xeb   :  { %213 = vrot.lane.b32.xlu0 %v199_v34, %s1457_s16  ;;  %v1778_v35 = vld [vmem:[%s2074_s5 + $0x28] sm:$0xff] }
  0xec   :  { %v201_v37 = vpop.f32.mrf.mxu0 }
  0xed   :  { %203 = vrot.lane.b32.xlu1 %v187_v36, %s1457_s16  ;;  %v1790_v37 = vld [vmem:[%s2074_s5 + $0x20] sm:$0xff] }
  0xef   :  { %209 = vrot.lane.b32.xlu0 %v189_v38, %s1457_s16 }
  0xf1   :  { %238 = vperm.xlu1 %1393, %v1575_v39  }
  0xf3   :  { %243 = vperm.xlu0 %1392, %v1581_v40  }
  0xf5   :  { %248 = vperm.xlu1 %1393, %v235_v41   ;;  %v1802_v41 = vld [vmem:[%s2074_s5 + $0x18] sm:$0xff] }
  0xf7   :  { %661 = vperm.xlu0 %1392, %v648_v42   ;;  %v1808_v42 = vld [vmem:[%s2074_s5 + $0x90] sm:$0xff] }
  0xf9   :  { %656 = vperm.xlu1 %1393, %v45_v13  }
  0xfb   :  { %651 = vperm.xlu0 %1392, %v44_v12  }
 0x157   :  { %v206_v45 = vpop.permute.xlu1 %205 }
 0x159   :  { %v212_v46 = vpop.permute.xlu0 %211 }
 0x15a   :  { %v219_v47 = vsel %vm217_vm2, %v206_v45, %v212_v46  ;;  %v222_v48 = vsel %vm217_vm2, %v212_v46, %v206_v45  ;;  %v1816_v45 = vld [vmem:[%s2074_s5 + $0x10] sm:$0xff]  ;;  %v1822_v46 = vld [vmem:[%s2074_s5 + $0x88] sm:$0xff] }
 0x15b   :  { %v208_v49 = vpop.permute.xlu1 %207  ;;  %v226_v50 = vmax.f32 %v191_v26, %v219_v47  ;;  %v227_v51 = vmax.f32 %v193_v28, %v222_v48  ;;  %v1730_v26 = vld [vmem:[%s2074_s5 + $0x48] sm:$0xff]  ;;  %v1742_v28 = vld [vmem:[%s2074_s5 + $0x40] sm:$0xff] }
 0x15c   :  { %v1828_v47 = vld [vmem:[%s2074_s5 + $0x8] sm:$0xff]  ;;  %v1834_v48 = vld [vmem:[%s2074_s5 + $0x80] sm:$0xff] }
 0x15d   :  { %v214_v52 = vpop.permute.xlu0 %213  ;;  %v582_v57 = vrot.slane %v226_v50, 6  ;;  %v584_v58 = vrot.slane %v227_v51, 6 }
 0x15e   :  { %v220_v53 = vsel %vm217_vm2, %v208_v49, %v214_v52  ;;  %v223_v54 = vsel %vm217_vm2, %v214_v52, %v208_v49  ;;  %v1840_v49 = vld [vmem:[%s2074_s5] sm:$0xff]  ;;  %v1419_v52 = vld [vmem:[%s2068_s0 + $0xd0] ss:$8 sps:$4 sm:$0x3f]  }
 0x15f   :  { %v228_v55 = vmax.f32 %v197_v31, %v220_v53  ;;  %v229_v56 = vmax.f32 %v199_v34, %v223_v54  ;;  %v204_v60 = vpop.permute.xlu1 %203  ;;  %v1754_v31 = vld [vmem:[%s2074_s5 + $0x38] sm:$0xff]  ;;  %v1772_v34 = vld [vmem:[%s2074_s5 + $0xa8] sm:$0xff] }
 0x161   :  { %v586_v59 = vrot.slane %v228_v55, 6  ;;  %1243 = vmatprep.subr.msk.mxu1 %vm261_vm3, %v229_v56  ;;  %v588_v61 = vrot.slane %v229_v56, 6  ;;  %v210_v62 = vpop.permute.xlu0 %209 }
 0x162   :  { %v218_v63 = vsel %vm217_vm2, %v204_v60, %v210_v62  ;;  %v221_v0 = vsel %vm217_vm2, %v210_v62, %v204_v60  ;;  %1244 = vmatpush1.msk.msra.mxu1 %vm261_vm3, %v228_v55 }
 0x163   :  { %v587_v2 = vsel %vm261_vm3, %v582_v57, %v586_v59  ;;  %v589_v3 = vsel %vm261_vm3, %v584_v58, %v588_v61  ;;  %v224_v4 = vmax.f32 %v187_v36, %v218_v63  ;;  %v225_v5 = vmax.f32 %v189_v38, %v221_v0  ;;  %296 = vmatprep.subr.mxu1 %v227_v51  ;;  %v1784_v36 = vld [vmem:[%s2074_s5 + $0xa0] sm:$0xff]  ;;  %v1796_v38 = vld [vmem:[%s2074_s5 + $0x98] sm:$0xff] }
 0x164   :  { %600 = vst [vmem:[%s2072_s7 + $0x40] sm:$0xf] %v587_v2  ;;  %601 = vst [vmem:[%s2072_s7 + $0x48] sm:$0xf] %v589_v3  ;;  %297 = vmatpush1.msra.mxu1 %v226_v50  ;;  %v1422_v59 = vld [vmem:[%s2068_s0 + $0xc4] ss:$8 sps:$4 sm:$0xff]  }
 0x165   :  { %v580_v8 = vrot.slane %v224_v4, 6  ;;  %v581_v9 = vrot.slane %v225_v5, 6  ;;  %298 = vmatprep.subr.mxu1 %v225_v5  ;;  %v1417_v50 = vld [vmem:[%s2068_s0 + $0xd4] ss:$8 sps:$4 sm:$0x3f]  }
 0x166   :  { %299 = vmatpush1.msra.mxu1 %v224_v4  ;;  %v1420_v63 = vld [vmem:[%s2068_s0 + $0xc0] ss:$8 sps:$4 sm:$0xff]   ;;  %v1425_v3 = vld [vmem:[%s2068_s0 + $0xb4] ss:$8 sps:$4 sm:$0xff]  }
 0x167   :  { %v583_v12 = vsel %vm261_vm3, %v580_v8, %v582_v57  ;;  %v585_v13 = vsel %vm261_vm3, %v581_v9, %v584_v58  ;;  %596 = vst [vmem:[%s2072_s7 + $0x20] sm:$0xfc] %v580_v8  ;;  %597 = vst [vmem:[%s2072_s7 + $0x28] sm:$0xfc] %v581_v9  ;;  %1245 = vmatmul.mubr.msk.f32.vlgmr.msra.gmra.mxu1 %vm251_vm4, %v1620_v6  ;;  %1306 = vmatprep.subr.mxu1 %v1625_v7  ;;  %v747_v58 = vsel %vm145_vm0, %v1419_v52, 0 }
 0x168   :  { %598 = vst [vmem:[%s2072_s7 + $0x30] sm:$0xff] %v583_v12  ;;  %599 = vst [vmem:[%s2072_s7 + $0x38] sm:$0xff] %v585_v13  ;;  %338 = vmatprep.mubr.f32.mxu1 %v1458_v30  ;;  %1307 = vmatpush3.msra.mxu1 %v1630_v10  ;;  %v1423_v9 = vld [vmem:[%s2068_s0 + $0xb0] ss:$8 sps:$4 sm:$0xff]   ;;  %v1428_v13 = vld [vmem:[%s2068_s0 + $0xa4] ss:$8 sps:$4 sm:$0xff]  }
 0x169   :  { %1308 = vmatprep.subr.mxu1 %v1635_v11  ;;  %v1434_v52 = vld [vmem:[%s2068_s0 + $0x84] ss:$8 sps:$4 sm:$0xff]  }
 0x16a   :  { %1309 = vmatpush3.msra.mxu1 %v1651_v14 }
 0x16b   :  { %1246 = vmatmul.mubr.msk.f32.gmra.mxu1 %vm251_vm4, %v1663_v15  ;;  %1310 = vmatprep.subr.mxu1 %v1669_v16 }
 0x16c   :  { %344 = vmatprep.mubr.f32.mxu1 %v1458_v30  ;;  %1311 = vmatpush3.msra.mxu1 %v1675_v17  ;;  %v239_v53 = vpop.permute.xlu1 %238 }
 0x16d   :  { %1312 = vmatprep.subr.mxu1 %v1681_v18 }
 0x16e   :  { %1313 = vmatpush3.msra.mxu1 %v1689_v19  ;;  %v244_v60 = vpop.permute.xlu0 %243 }
 0x16f   :  { %1247 = vmatmul.mubr.msk.f32.gmra.mxu1 %vm251_vm4, %v232_v20  ;;  %1314 = vmatprep.subr.mxu1 %v1699_v21  ;;  %v1426_v20 = vld [vmem:[%s2068_s0 + $0xa0] ss:$8 sps:$4 sm:$0xff]  }
 0x170   :  { %1315 = vmatpush3.msra.mxu1 %v1705_v22  ;;  %v249_v4 = vpop.permute.xlu1 %248 }
 0x171   :  { %1316 = vmatprep.subr.mxu1 %v1711_v23 }
 0x172   :  { %1317 = vmatpush3.msra.mxu1 %v1718_v24 }
 0x173   :  { %1318 = vmatprep.subr.mxu1 %v1724_v25 }
 0x174   :  { %1319 = vmatpush3.msra.mxu1 %v1730_v26 }
 0x175   :  { %1320 = vmatprep.subr.mxu1 %v1736_v27 }
 0x176   :  { %1321 = vmatpush3.msra.mxu1 %v1742_v28 }
 0x177   :  { %1322 = vmatprep.subr.mxu1 %v1748_v29 }
 0x178   :  { %1323 = vmatpush3.msra.mxu1 %v1754_v31 }
 0x179   :  { %1324 = vmatprep.subr.mxu1 %v1760_v32 }
 0x17a   :  { %1325 = vmatpush3.msra.mxu1 %v1766_v33 }
 0x17b   :  { %1326 = vmatprep.subr.mxu1 %v1772_v34 }
 0x17c   :  { %1327 = vmatpush3.msra.mxu1 %v1778_v35 }
 0x17d   :  { %1328 = vmatprep.subr.mxu1 %v1784_v36 }
 0x17e   :  { %1329 = vmatpush3.msra.mxu1 %v1790_v37 }
 0x17f   :  { %1330 = vmatprep.subr.mxu1 %v1796_v38 }
 0x180   :  { %1331 = vmatpush3.msra.mxu1 %v1802_v41 }
 0x181   :  { %1332 = vmatprep.subr.mxu1 %v1808_v42 }
 0x182   :  { %1333 = vmatpush3.msra.mxu1 %v1816_v45 }
 0x183   :  { %1334 = vmatprep.subr.mxu1 %v1822_v46 }
 0x184   :  { %1335 = vmatpush3.msra.mxu1 %v1828_v47 }
 0x185   :  { %1336 = vmatprep.subr.mxu1 %v1834_v48 }
 0x186   :  { %1337 = vmatpush3.msra.mxu1 %v1840_v49 }
 0x187   :  { %1282 = vmatprep.subr.msk.bf16.mxu1 %vm145_vm0, %v1417_v50  ;;  %v1431_v50 = vld [vmem:[%s2068_s0 + $0x94] ss:$8 sps:$4 sm:$0xff]  }
 0x227   :  { %v334_v51 = vpop.f32.mrf.mxu1 }
 0x228   :  { %v335_v56 = vadd.f32 %v334_v51, %v239_v53  ;;  %v1429_v51 = vld [vmem:[%s2068_s0 + $0x90] ss:$8 sps:$4 sm:$0xff]  }
 0x229   :  { %v336_v54 = vpop.f32.mrf.mxu1 }
 0x22a   :  { %v337_v55 = vadd.f32 %v336_v54, %v239_v53  ;;  %v1432_v53 = vld [vmem:[%s2068_s0 + $0x80] ss:$8 sps:$4 sm:$0xff]   ;;  %v1437_v54 = vld [vmem:[%s2068_s0 + $0x74] ss:$8 sps:$4 sm:$0xff]  }
 0x22b   :  { %v340_v57 = vpop.f32.mrf.mxu1 }
 0x22c   :  { %447 = vmatprep.mubr.f32.mxu1 %v337_v55  ;;  %v341_v0 = vadd.f32 %v340_v57, %v244_v60  ;;  %v1435_v55 = vld [vmem:[%s2068_s0 + $0x70] ss:$8 sps:$4 sm:$0xff]   ;;  %v1439_v57 = vld [vmem:[%s2069_s1 + $0x8] ss:$0 sps:$4 sm:$0x11]  }
 0x22d   :  { %v342_v61 = vpop.f32.mrf.mxu1  ;;  %448 = vmatmul.mubr.f32.vlgmr.msra.gmra.mxu1 %v335_v56  ;;  %v1438_v56 = vld [vmem:[%s2069_s1] sm:$0xff]  }
 0x22e   :  { %v343_v62 = vadd.f32 %v342_v61, %v244_v60  ;;  %755 = vmatpush1.bf16.msra.mxu1 %v747_v58  ;;  %v466_v58 = vld [vmem:[%s2075_s6 + $0x18] sm:$0xff]  ;;  %v463_v60 = vld [vmem:[%s2075_s6] sm:$0xff] }
 0x22f   :  { %v346_v2 = vpop.f32.mrf.mxu1  ;;  %756 = vmatprep.subr.bf16.mxu1 %v1422_v59  ;;  %505 = vmatprep.subr.mxu0 %v466_v58  ;;  %v465_v59 = vld [vmem:[%s2075_s6 + $0x10] sm:$0xff] }
 0x230   :  { %452 = vmatprep.mubr.f32.mxu1 %v343_v62  ;;  %v347_v12 = vadd.f32 %v346_v2, %v249_v4  ;;  %506 = vmatpush1.msra.mxu0 %v465_v59 }
 0x231   :  { %v348_v5 = vpop.f32.mrf.mxu1  ;;  %453 = vmatmul.mubr.f32.gmra.mxu1 %v341_v0 }
 0x232   :  { %v349_v8 = vadd.f32 %v348_v5, %v249_v4  ;;  %757 = vmatpush1.bf16.msra.mxu1 %v1420_v63 }
 0x233   :  { %758 = vmatprep.subr.bf16.mxu1 %v1425_v3 }
 0x234   :  { %457 = vmatprep.mubr.f32.mxu1 %v349_v8 }
 0x235   :  { %458 = vmatmul.mubr.f32.gmra.mxu1 %v347_v12 }
 0x236   :  { %759 = vmatpush1.bf16.msra.mxu1 %v1423_v9  ;;  %784 = vmatprep.mubr.bf16.mxu1 %v1456_v1 }
 0x237   :  { %760 = vmatprep.subr.bf16.mxu1 %v1428_v13  ;;  %v657_v13 = vpop.permute.xlu1 %656 }
 0x23a   :  { %761 = vmatpush1.bf16.msra.mxu1 %v1426_v20 }
 0x23b   :  { %762 = vmatprep.subr.bf16.mxu1 %v1431_v50 }
 0x23e   :  { %763 = vmatpush1.bf16.msra.mxu1 %v1429_v51  ;;  %v662_v51 = vpop.permute.xlu0 %661 }
 0x23f   :  { %764 = vmatprep.subr.bf16.mxu1 %v1434_v52 }
 0x242   :  { %765 = vmatpush1.bf16.msra.mxu1 %v1432_v53 }
 0x243   :  { %766 = vmatprep.subr.bf16.mxu1 %v1437_v54 }
 0x246   :  { %767 = vmatpush1.bf16.msra.mxu1 %v1435_v55 }
 0x247   :  { %1099 = vmatprep.subr.mxu1 %v466_v58  ;;  %v652_v58 = vpop.permute.xlu0 %651 }
 0x249   :  { %1283 = vmatmul.mubr.msk.bf16.vlgmr.msra.gmra.mxu1 %vm138_vm1, %v1438_v56 }
 0x24a   :  { %794 = vmatprep.mubr.bf16.mxu1 %v1456_v1  ;;  %v464_v1 = vld [vmem:[%s2075_s6 + $0x8] sm:$0xff]  ;;  %1100 = vmatpush1.msra.mxu1 %v465_v59 }
 0x24b   :  { %507 = vmatprep.subr.mxu0 %v464_v1  ;;  %1101 = vmatprep.subr.mxu1 %v464_v1 }
 0x24c   :  { %508 = vmatpush1.msra.mxu0 %v463_v60  ;;  %1102 = vmatpush1.msra.mxu1 %v463_v60 }
 0x251   :  { %1284 = vmatmul.mubr.msk.bf16.gmra.mxu1 %vm138_vm1, %v1439_v57 }
 0x252   :  { %1135 = vmatprep.mubr.f32.mxu1 %v1458_v30 }
 0x2ed   :  { %v1338_v61 = vpop.f32.mrf.mxu1 }
 0x2ef   :  { %v1339_v62 = vpop.f32.mrf.mxu1 }
 0x2f0   :  { %v1340_v63 = vadd.f32 %v1339_v62, %v1338_v61  ;;  %v832_v62 = vld [vmem:[%s2071_s4 + $0x10] sm:$0x7] }
 0x2f1   :  { %v1341_v0 = vpop.f32.mrf.mxu1 }
 0x2f2   :  { %1248 = vmatmul.mubr.msk.f32.vlgmr.msra.gmra.mxu0 %vm467_vm5, %v1340_v63 }
 0x2f3   :  { %v1342_v2 = vpop.f32.mrf.mxu1  ;;  %547 = vmatprep.mubr.f32.mxu0 %v1458_v30 }
 0x2f4   :  { %v1343_v3 = vadd.f32 %v1342_v2, %v1341_v0 }
 0x2f5   :  { %v1344_v4 = vpop.f32.mrf.mxu1 }
 0x2f6   :  { %1249 = vmatmul.mubr.msk.f32.gmra.mxu0 %vm467_vm5, %v1343_v3 }
 0x2f7   :  { %v1345_v5 = vpop.f32.mrf.mxu1  ;;  %553 = vmatprep.mubr.f32.mxu0 %v1458_v30 }
 0x2f8   :  { %v1346_v8 = vadd.f32 %v1345_v5, %v1344_v4 }
 0x2fa   :  { %1250 = vmatmul.mubr.msk.f32.gmra.mxu0 %vm467_vm5, %v1346_v8 }
 0x2fb   :  { %927 = vmatprep.mubr.f32.mxu0 %v1458_v30 }
 0x309   :  { %v786_v9 = vpop.f32.mrf.mxu1 }
 0x30a   :  { %v787_v1 = vadd.f32 %v786_v9, %v652_v58 }
 0x30b   :  { %v788_v12 = vpop.f32.mrf.mxu1 }
 0x30c   :  { %v789_v61 = vadd.f32 %v788_v12, %v652_v58 }
 0x30d   :  { %v790_v20 = vpop.f32.mrf.mxu1 }
 0x30e   :  { %v791_v50 = vadd.f32 %v790_v20, %v657_v13 }
 0x30f   :  { %v792_v52 = vpop.f32.mrf.mxu1 }
 0x310   :  { %v793_v53 = vadd.f32 %v792_v52, %v657_v13  ;;  %805 = vrot.lane.b32.xlu1 %v791_v50, %s1457_s16 }
 0x311   :  { %v796_v54 = vpop.f32.mrf.mxu1 }
 0x312   :  { %v797_v55 = vadd.f32 %v796_v54, %v662_v51  ;;  %811 = vrot.lane.b32.xlu0 %v793_v53, %s1457_s16 }
 0x313   :  { %v798_v56 = vpop.f32.mrf.mxu1 }
 0x314   :  { %v799_v57 = vadd.f32 %v798_v56, %v662_v51  ;;  %807 = vrot.lane.b32.xlu1 %v797_v55, %s1457_s16 }
 0x315   :  { %v800_v59 = vpop.f32.mrf.mxu1 }
 0x316   :  { %813 = vrot.lane.b32.xlu0 %v799_v57, %s1457_s16 }
 0x317   :  { %v801_v60 = vpop.f32.mrf.mxu1 }
 0x318   :  { %803 = vrot.lane.b32.xlu1 %v787_v1, %s1457_s16 }
 0x31a   :  { %809 = vrot.lane.b32.xlu0 %v789_v61, %s1457_s16 }
 0x31c   :  { %835 = vperm.xlu1 %1393, %v1575_v39  }
 0x31e   :  { %840 = vperm.xlu0 %1392, %v1581_v40  }
 0x320   :  { %845 = vperm.xlu1 %1393, %v832_v62  }
 0x382   :  { %v806_v63 = vpop.permute.xlu1 %805 }
 0x384   :  { %v812_v0 = vpop.permute.xlu0 %811 }
 0x385   :  { %v816_v2 = vsel %vm217_vm2, %v806_v63, %v812_v0  ;;  %v819_v3 = vsel %vm217_vm2, %v812_v0, %v806_v63 }
 0x386   :  { %v808_v4 = vpop.permute.xlu1 %807  ;;  %v823_v5 = vmax.f32 %v791_v50, %v816_v2  ;;  %v824_v8 = vmax.f32 %v793_v53, %v819_v3 }
 0x388   :  { %v814_v9 = vpop.permute.xlu0 %813  ;;  %v1177_v20 = vrot.slane %v823_v5, 6  ;;  %v1179_v51 = vrot.slane %v824_v8, 6 }
 0x389   :  { %v817_v39 = vsel %vm217_vm2, %v808_v4, %v814_v9  ;;  %v820_v12 = vsel %vm217_vm2, %v814_v9, %v808_v4 }
 0x38a   :  { %v825_v40 = vmax.f32 %v797_v55, %v817_v39  ;;  %v826_v13 = vmax.f32 %v799_v57, %v820_v12  ;;  %v804_v56 = vpop.permute.xlu1 %803 }
 0x38c   :  { %v1181_v52 = vrot.slane %v825_v40, 6  ;;  %v1183_v54 = vrot.slane %v826_v13, 6  ;;  %v810_v58 = vpop.permute.xlu0 %809  ;;  %1285 = vmatprep.subr.msk.mxu0 %vm261_vm3, %v826_v13 }
 0x38d   :  { %v815_v50 = vsel %vm217_vm2, %v804_v56, %v810_v58  ;;  %v818_v53 = vsel %vm217_vm2, %v810_v58, %v804_v56  ;;  %1286 = vmatpush1.msk.msra.mxu0 %vm261_vm3, %v825_v40 }
 0x38e   :  { %v1182_v59 = vsel %vm261_vm3, %v1177_v20, %v1181_v52  ;;  %v1184_v55 = vsel %vm261_vm3, %v1179_v51, %v1183_v54  ;;  %v821_v57 = vmax.f32 %v787_v1, %v815_v50  ;;  %v822_v60 = vmax.f32 %v789_v61, %v818_v53  ;;  %891 = vmatprep.subr.mxu0 %v824_v8 }
 0x38f   :  { %1303 = vst [vmem:[%s2072_s7 + $0x90] sm:$0xf] %v1182_v59  ;;  %1304 = vst [vmem:[%s2072_s7 + $0x98] sm:$0xf] %v1184_v55  ;;  %892 = vmatpush1.msra.mxu0 %v823_v5 }
 0x390   :  { %v1175_v44 = vrot.slane %v821_v57, 6  ;;  %v1176_v62 = vrot.slane %v822_v60, 6  ;;  %893 = vmatprep.subr.mxu0 %v822_v60 }
 0x391   :  { %894 = vmatpush1.msra.mxu0 %v821_v57 }
 0x392   :  { %v1178_v63 = vsel %vm261_vm3, %v1175_v44, %v1177_v20  ;;  %v1180_v0 = vsel %vm261_vm3, %v1176_v62, %v1179_v51  ;;  %1299 = vst [vmem:[%s2072_s7 + $0x70] sm:$0xfc] %v1175_v44  ;;  %1300 = vst [vmem:[%s2072_s7 + $0x78] sm:$0xfc] %v1176_v62  ;;  %1287 = vmatmul.mubr.msk.f32.vlgmr.msra.gmra.mxu0 %vm251_vm4, %v1620_v6  ;;  %1347 = vmatprep.subr.mxu0 %v1625_v7  ;;  %v829_v6 = vld [vmem:[%s2073_s3 + $0x10] sm:$0x7] }
 0x393   :  { %1301 = vst [vmem:[%s2072_s7 + $0x80] sm:$0xff] %v1178_v63  ;;  %1302 = vst [vmem:[%s2072_s7 + $0x88] sm:$0xff] %v1180_v0  ;;  %933 = vmatprep.mubr.f32.mxu0 %v1458_v30  ;;  %1348 = vmatpush3.msra.mxu0 %v1630_v10 }
 0x394   :  { %1349 = vmatprep.subr.mxu0 %v1635_v11 }
 0x395   :  { %1350 = vmatpush3.msra.mxu0 %v1651_v14 }
 0x396   :  { %1288 = vmatmul.mubr.msk.f32.gmra.mxu0 %vm251_vm4, %v1663_v15  ;;  %1351 = vmatprep.subr.mxu0 %v1669_v16 }
 0x397   :  { %939 = vmatprep.mubr.f32.mxu0 %v1458_v30  ;;  %1352 = vmatpush3.msra.mxu0 %v1675_v17 }
 0x398   :  { %1353 = vmatprep.subr.mxu0 %v1681_v18 }
 0x399   :  { %1354 = vmatpush3.msra.mxu0 %v1689_v19 }
 0x39a   :  { %1289 = vmatmul.mubr.msk.f32.gmra.mxu0 %vm251_vm4, %v829_v6  ;;  %1355 = vmatprep.subr.mxu0 %v1699_v21 }
 0x39b   :  { %1356 = vmatpush3.msra.mxu0 %v1705_v22 }
 0x39c   :  { %1357 = vmatprep.subr.mxu0 %v1711_v23 }
 0x39d   :  { %1358 = vmatpush3.msra.mxu0 %v1718_v24 }
 0x39e   :  { %1359 = vmatprep.subr.mxu0 %v1724_v25 }
 0x39f   :  { %1360 = vmatpush3.msra.mxu0 %v1730_v26  ;;  %v1459_v26 = vmov 1966171168  }
 0x3a0   :  { %1361 = vmatprep.subr.mxu0 %v1736_v27  ;;  %v606_v27 = vunpack.c.l.s4 %v1459_v26 }
 0x3a1   :  { %1362 = vmatpush3.msra.mxu0 %v1742_v28 }
 0x3a2   :  { %1363 = vmatprep.subr.mxu0 %v1748_v29  ;;  %v607_v28 = vunpack.c.0.s8 %v606_v27  ;;  %v609_v29 = vshrl.u32 %v215_v43, 7 }
 0x3a3   :  { %1364 = vmatpush3.msra.mxu0 %v1754_v31 }
 0x3a4   :  { %1365 = vmatprep.subr.mxu0 %v1760_v32  ;;  %v2024_v32 = vsub.s32 %v607_v28, %v609_v29 }
 0x3a5   :  { %1366 = vmatpush3.msra.mxu0 %v1766_v33 }
 0x3a6   :  { %1367 = vmatprep.subr.mxu0 %v1772_v34 }
 0x3a7   :  { %1368 = vmatpush3.msra.mxu0 %v1778_v35 }
 0x3a8   :  { %1369 = vmatprep.subr.mxu0 %v1784_v36 }
 0x3a9   :  { %1370 = vmatpush3.msra.mxu0 %v1790_v37 }
 0x3aa   :  { %1371 = vmatprep.subr.mxu0 %v1796_v38 }
 0x3ab   :  { %1372 = vmatpush3.msra.mxu0 %v1802_v41 }
 0x3ac   :  { %1373 = vmatprep.subr.mxu0 %v1808_v42  ;;  %v836_v42 = vpop.permute.xlu1 %835 }
 0x3ad   :  { %1374 = vmatpush3.msra.mxu0 %v1816_v45 }
 0x3ae   :  { %1375 = vmatprep.subr.mxu0 %v1822_v46 }
 0x3af   :  { %1376 = vmatpush3.msra.mxu0 %v1828_v47 }
 0x3b0   :  { %1377 = vmatprep.subr.mxu0 %v1834_v48  ;;  %v846_v3 = vpop.permute.xlu1 %845 }
 0x3b1   :  { %1378 = vmatpush3.msra.mxu0 %v1840_v49  ;;  %v841_v49 = vpop.permute.xlu0 %840 }
 0x3b2   :  { %v543_v7 = vpop.f32.mrf.mxu0 }
 0x3b3   :  { %570 = vst [vmem:[%s2072_s7] sm:$0xff] %v543_v7 }
 0x3b4   :  { %v545_v10 = vpop.f32.mrf.mxu0 }
 0x3b5   :  { %571 = vst [vmem:[%s2072_s7 + $0x8] sm:$0xff] %v545_v10 }
 0x3b6   :  { %v549_v11 = vpop.f32.mrf.mxu0 }
 0x3b7   :  { %572 = vst [vmem:[%s2072_s7 + $0x10] sm:$0xff] %v549_v11 }
 0x3b8   :  { %v551_v14 = vpop.f32.mrf.mxu0 }
 0x3b9   :  { %573 = vst [vmem:[%s2072_s7 + $0x18] sm:$0xff] %v551_v14 }
 0x3ba   :  { %v555_v15 = vpop.f32.mrf.mxu0 }
 0x3bb   :  { %v560_v16 = vsub.f32 0.0, %v555_v15  ;;  %574 = vst [vmem:[%s2072_s7 + $0x20] sm:$0x3] %v555_v15 }
 0x3bc   :  { %v557_v17 = vpop.f32.mrf.mxu0 }
 0x3bd   :  { %v562_v18 = vmul.f32 1.442695, %v560_v16  ;;  %v561_v19 = vsub.f32 0.0, %v557_v17  ;;  %575 = vst [vmem:[%s2072_s7 + $0x28] sm:$0x3] %v557_v17 }
 0x3bf   :  { %1440 = vpow2.f32 %v562_v18  ;;  %v564_v21 = vmul.f32 1.442695, %v561_v19 }
 0x3c1   :  { %1442 = vpow2.f32 %v564_v21 }
 0x3cc   :  { %v1441_v22 = vpop.eup %1440 }
 0x3cd   :  { %v566_v23 = vadd.f32 1.0, %v1441_v22 }
 0x3ce   :  { %v1443_v24 = vpop.eup %1442 }
 0x3cf   :  { %v567_v25 = vadd.f32 1.0, %v1443_v24  ;;  %1444 = vrcp.f32 %v566_v23 }
 0x3d1   :  { %1446 = vrcp.f32 %v567_v25 }
 0x3dc   :  { %v1445_v31 = vpop.eup %1444 }
 0x3de   :  { %v1447_v33 = vpop.eup %1446 }
 0x3df   :  { %v604_v34 = vcombine.low %v1445_v31, %v1447_v33 }
 0x3e1   :  { %v611_v35 = vrot.slane %v604_v34, %v2024_v32 }
 0x3e3   :  { %v618_v36 = vrot.slane %v611_v35, %v2024_v32 }
 0x3e5   :  { %v619_v38 = vcombine.high %v618_v36, %v618_v36 }
 0x3e7   :  { %1251 = vst.msk [vmem:[%s2072_s7 + $0x44] ss:$8 sm:$0x3] %vm2029_vm6, %v619_v38 }
 0x452   :  { %v929_v41 = vpop.f32.mrf.mxu0 }
 0x453   :  { %v930_v47 = vadd.f32 %v929_v41, %v836_v42 }
 0x454   :  { %v931_v45 = vpop.f32.mrf.mxu0 }
 0x455   :  { %v932_v46 = vadd.f32 %v931_v45, %v836_v42 }
 0x456   :  { %v935_v48 = vpop.f32.mrf.mxu0 }
 0x457   :  { %1042 = vmatprep.mubr.f32.mxu0 %v932_v46  ;;  %v936_v61 = vadd.f32 %v935_v48, %v841_v49 }
 0x458   :  { %v937_v1 = vpop.f32.mrf.mxu0  ;;  %1043 = vmatmul.mubr.f32.vlgmr.msra.gmra.mxu0 %v930_v47 }
 0x459   :  { %v938_v43 = vadd.f32 %v937_v1, %v841_v49 }
 0x45a   :  { %v941_v2 = vpop.f32.mrf.mxu0 }
 0x45b   :  { %1047 = vmatprep.mubr.f32.mxu0 %v938_v43  ;;  %v942_v8 = vadd.f32 %v941_v2, %v846_v3 }
 0x45c   :  { %v943_v4 = vpop.f32.mrf.mxu0  ;;  %1048 = vmatmul.mubr.f32.gmra.mxu0 %v936_v61 }
 0x45d   :  { %v944_v5 = vadd.f32 %v943_v4, %v846_v3 }
 0x45f   :  { %1052 = vmatprep.mubr.f32.mxu0 %v944_v5 }
 0x460   :  { %1053 = vmatmul.mubr.f32.gmra.mxu0 %v942_v8 }
 0x518   :  { %v1379_v9 = vpop.f32.mrf.mxu0 }
 0x51a   :  { %v1380_v39 = vpop.f32.mrf.mxu0 }
 0x51b   :  { %v1381_v12 = vadd.f32 %v1380_v39, %v1379_v9 }
 0x51c   :  { %v1382_v40 = vpop.f32.mrf.mxu0 }
 0x51d   :  { %1290 = vmatmul.mubr.msk.f32.vlgmr.msra.gmra.mxu1 %vm467_vm5, %v1381_v12 }
 0x51e   :  { %v1383_v13 = vpop.f32.mrf.mxu0  ;;  %1141 = vmatprep.mubr.f32.mxu1 %v1458_v30 }
 0x51f   :  { %v1384_v20 = vadd.f32 %v1383_v13, %v1382_v40 }
 0x520   :  { %v1385_v51 = vpop.f32.mrf.mxu0 }
 0x521   :  { %1291 = vmatmul.mubr.msk.f32.gmra.mxu1 %vm467_vm5, %v1384_v20 }
 0x522   :  { %v1386_v52 = vpop.f32.mrf.mxu0  ;;  %1147 = vmatprep.mubr.f32.mxu1 %v1458_v30 }
 0x523   :  { %v1387_v54 = vadd.f32 %v1386_v52, %v1385_v51 }
 0x525   :  { %1292 = vmatmul.mubr.msk.f32.gmra.mxu1 %vm467_vm5, %v1387_v54 }
 0x5dd   :  { %v1137_v56 = vpop.f32.mrf.mxu1 }
 0x5de   :  { %1293 = vst [vmem:[%s2072_s7 + $0x50] sm:$0xff] %v1137_v56 }
 0x5df   :  { %v1139_v58 = vpop.f32.mrf.mxu1 }
 0x5e0   :  { %1294 = vst [vmem:[%s2072_s7 + $0x58] sm:$0xff] %v1139_v58 }
 0x5e1   :  { %v1143_v50 = vpop.f32.mrf.mxu1 }
 0x5e2   :  { %1295 = vst [vmem:[%s2072_s7 + $0x60] sm:$0xff] %v1143_v50 }
 0x5e3   :  { %v1145_v53 = vpop.f32.mrf.mxu1 }
 0x5e4   :  { %1296 = vst [vmem:[%s2072_s7 + $0x68] sm:$0xff] %v1145_v53 }
 0x5e5   :  { %v1149_v30 = vpop.f32.mrf.mxu1 }
 0x5e6   :  { %v1154_v59 = vsub.f32 0.0, %v1149_v30  ;;  %1297 = vst [vmem:[%s2072_s7 + $0x70] sm:$0x3] %v1149_v30 }
 0x5e7   :  { %v1151_v55 = vpop.f32.mrf.mxu1 }
 0x5e8   :  { %v1156_v57 = vmul.f32 1.442695, %v1154_v59  ;;  %v1155_v60 = vsub.f32 0.0, %v1151_v55  ;;  %1298 = vst [vmem:[%s2072_s7 + $0x78] sm:$0x3] %v1151_v55 }
 0x5ea   :  { %1448 = vpow2.f32 %v1156_v57  ;;  %v1158_v44 = vmul.f32 1.442695, %v1155_v60 }
 0x5ec   :  { %1450 = vpow2.f32 %v1158_v44 }
 0x5f7   :  { %v1449_v62 = vpop.eup %1448 }
 0x5f8   :  { %v1160_v63 = vadd.f32 1.0, %v1449_v62 }
 0x5f9   :  { %v1451_v0 = vpop.eup %1450 }
 0x5fa   :  { %v1161_v6 = vadd.f32 1.0, %v1451_v0  ;;  %1452 = vrcp.f32 %v1160_v63 }
 0x5fc   :  { %1454 = vrcp.f32 %v1161_v6 }
 0x607   :  { %v1453_v7 = vpop.eup %1452 }
 0x609   :  { %v1455_v10 = vpop.eup %1454 }
 0x60a   :  { %v1199_v11 = vcombine.low %v1453_v7, %v1455_v10 }
 0x60c   :  { %v1206_v14 = vrot.slane %v1199_v11, %v2024_v32 }
 0x60e   :  { %v1213_v15 = vrot.slane %v1206_v14, %v2024_v32 }
 0x610   :  { %v1214_v16 = vcombine.high %v1213_v15, %v1213_v15 }
 0x612   :  { %1305 = vst.msk [vmem:[%s2072_s7 + $0x94] ss:$8 sm:$0x3] %vm2029_vm6, %v1214_v16 }

</bundles_post_ra>
